<compile_context>
chip_gen: v6e
topology: v6e:2x2x1
jax: 0.10.0
libtpu: 0.0.40
codegen_flags: <defaults>
</compile_context>

<pallas_src>
import functools

import jax
import jax.numpy as jnp
from jax.experimental import pallas as pl
from jax.experimental.pallas import tpu as pltpu


def _cdiv(a, b):
    return -(-a // b)


def _round_up(x, m):
    return _cdiv(x, m) * m


def _vmem_capacity_bytes():
    """Per-core VMEM capacity; falls back to the smallest generation (v7x)."""
    try:
        cap = getattr(pltpu.get_tpu_info(), "vmem_capacity_bytes", None)
        if cap:
            return int(cap)
    except Exception:
        pass
    return 64 * 1024 * 1024


def make_rotated_rmsnorm_matrix(R, weight, mxu_dtype=jnp.float32):
    """Fused constant M = R^T @ diag(w) @ R.

    Costs ~2*d^3 fp32 FLOPs -- compute it ONCE and pass it to
    `rmsnorm_rotated(..., fused_M=M)` on every forward call.
    """
    R32 = R.astype(jnp.float32)
    w32 = weight.astype(jnp.float32)
    return ((R32.T * w32[None, :]) @ R32).astype(mxu_dtype)


def _rmsnorm_rotated_kernel(x_ref, m_ref, o_ref, scale_ref, *, eps):
    """One (tm, d) row tile x one (d, tn) column slab of the fused matrix."""
    # Per-row 1/RMS in fp32, computed once per row tile (first column step)
    # and stashed in a tiny VMEM scratch so column slabs don't recompute it.
    @pl.when(pl.program_id(1) == 0)
    def _():
        x32 = x_ref[...].astype(jnp.float32)
        var = jnp.mean(x32 * x32, axis=-1, keepdims=True)
        scale_ref[...] = jax.lax.rsqrt(var + eps)

    # Native-dtype x straight to the MXU (fp32 accumulation); the per-row
    # scalar scale commutes with the linear map, so apply it afterwards.
    y = jnp.dot(x_ref[...].astype(m_ref.dtype), m_ref[...],
                preferred_element_type=jnp.float32)
    o_ref[...] = (y * scale_ref[...]).astype(o_ref.dtype)


def rmsnorm_rotated(x, R=None, weight=None, eps=1e-5, *, fused_M=None,
                    mxu_dtype=None, max_rows=None):
    """RMSNorm in a rotated basis; output has the same shape/dtype as `x`.

    x:        (..., d) activations (bf16 or fp32).
    R/weight: (d, d) orthogonal matrix and (d,) scale -- only used if
              `fused_M` is not supplied.
    fused_M:  pre-built R^T @ diag(w) @ R (see make_rotated_rmsnorm_matrix);
              pass this to hoist the O(d^3) fusion out of the per-call path.
    mxu_dtype: matmul-operand dtype. Default: bf16 for bf16 activations (full
              MXU rate on v6e/v7x), fp32 otherwise (reference-accurate).
    max_rows: optional cap on the row tile (mainly for testing multi-block
              grids on small inputs).
    """
    orig_shape, orig_dtype = x.shape, x.dtype
    d = orig_shape[-1]
    x2 = x.reshape(-1, d)
    n = x2.shape[0]

    if mxu_dtype is None:
        mxu_dtype = jnp.bfloat16 if orig_dtype == jnp.bfloat16 else jnp.float32
    if fused_M is None:
        if R is None or weight is None:
            raise ValueError("pass either fused_M or both R and weight")
        fused_M = make_rotated_rmsnorm_matrix(R, weight, mxu_dtype)
    else:
        fused_M = fused_M.astype(mxu_dtype)

    x_bytes = jnp.dtype(orig_dtype).itemsize
    mxu_bytes = jnp.dtype(mxu_dtype).itemsize
    # dtype-packed sublane granule: 8 (fp32) / 16 (bf16) / 32 (int8/fp8).
    sub = max(8, 32 // x_bytes)

    # Generation-aware VMEM budget: leave >= 12 MiB (and >= 1/8 of capacity)
    # of headroom -> ~52 MiB on v7x (64 MiB/TC), ~112 MiB on v5e/v6e (128 MiB).
    cap = _vmem_capacity_bytes()
    budget = cap - max(cap // 8, 12 * 1024 * 1024)

    # Fused-M layout: fully resident + single-buffered when it fits in half
    # the budget; otherwise streamed as (d, tn) column slabs (tn a multiple of
    # 256, double-buffered) under a second grid axis.
    if d * d * mxu_bytes <= budget // 2:
        tn, m_buffers = d, 1
    else:
        tn = max(256, ((budget // 2) // (2 * d * mxu_bytes)) // 256 * 256)
        tn = min(tn, _round_up(d, 256))
        m_buffers = 2
    n_col_tiles = _cdiv(d, tn)

    # Row tile from the remaining budget: 2x x-tile + 2x out-tile pipeline
    # buffers plus fp32 temporaries per row, capped at 2048 rows and at the
    # (rounded) row count; keep >= 2 row blocks so the v7x megacore split has
    # work on both TensorCores.
    remaining = max(budget - m_buffers * d * tn * mxu_bytes, sub * 4 * (d + tn))
    per_row = 2 * d * x_bytes + 2 * tn * x_bytes + 4 * d + 4 * tn
    tm = max(sub, remaining // per_row)
    tm = min(tm, 2048 if max_rows is None else max_rows, _round_up(n, sub))
    tm = _round_up(tm, sub)
    if _cdiv(n, tm) == 1 and n > sub:
        tm = _round_up(_cdiv(n, 2), sub)
    grid = (_cdiv(n, tm), n_col_tiles)

    cost = pl.CostEstimate(
        flops=int(2 * n * d * d + 3 * n * d),
        transcendentals=int(n),
        bytes_accessed=int(2 * n * d * x_bytes + d * d * mxu_bytes),
    )

    def _run(single_buffer_m):
        m_kwargs = {"pipeline_mode": pl.Buffered(1)} if single_buffer_m else {}
        return pl.pallas_call(
            functools.partial(_rmsnorm_rotated_kernel, eps=eps),
            out_shape=jax.ShapeDtypeStruct((n, d), orig_dtype),
            grid_spec=pltpu.PrefetchScalarGridSpec(
                num_scalar_prefetch=0,
                grid=grid,
                in_specs=[
                    pl.BlockSpec((tm, d), lambda i, j: (i, 0)),           # x rows
                    pl.BlockSpec((d, tn), lambda i, j: (0, j), **m_kwargs),  # fused M
                ],
                out_specs=pl.BlockSpec((tm, tn), lambda i, j: (i, j)),
                scratch_shapes=[pltpu.VMEM((tm, 1), jnp.float32)],        # 1/RMS
            ),
            compiler_params=pltpu.CompilerParams(
                dimension_semantics=("parallel", "arbitrary"),
                vmem_limit_bytes=int(budget),
            ),
            cost_estimate=cost,
        )(x2, fused_M)

    if m_buffers == 1:
        try:
            out = _run(True)
        except Exception:
            # pl.Buffered(1) not accepted on this jax version -> default
            # double-buffering of the (constant-index) M block.
            out = _run(False)
    else:
        out = _run(False)

    return out.reshape(orig_shape)


def rmsnorm_rotated_ref(x, R, weight, eps=1e-5):
    """Pure-JAX mirror of the torch forward (fp32 math, two matmuls)."""
    x32 = x.astype(jnp.float32)
    var = jnp.mean(x32 * x32, axis=-1, keepdims=True)
    xhat = x32 * jax.lax.rsqrt(var + eps)
    R32 = R.astype(jnp.float32)
    y = (xhat @ R32.T * weight.astype(jnp.float32)) @ R32
    return y.astype(x.dtype)


if __name__ == "__main__":
    d = 128  # hidden size (feature axis -> TPU lanes)

    key = jax.random.PRNGKey(0)
    kx, kr, kw, kx2, kx3 = jax.random.split(key, 5)

    # Deterministic orthogonal R (QR of a fixed random matrix) and non-trivial
    # weight to exercise the fused diag(w) path.
    R = jnp.linalg.qr(jax.random.normal(kr, (d, d), dtype=jnp.float32))[0]
    weight = 0.5 + jax.random.uniform(kw, (d,), dtype=jnp.float32)

    # --- bf16 activations; fused M hoisted once out of the per-call path ----
    M_bf16 = make_rotated_rmsnorm_matrix(R, weight, jnp.bfloat16)
    x = jax.random.normal(kx, (2, 8, d), dtype=jnp.float32).astype(jnp.bfloat16)
    y = jax.block_until_ready(rmsnorm_rotated(x, eps=1e-5, fused_M=M_bf16))
    y_ref = rmsnorm_rotated_ref(x, R, weight, eps=1e-5)
    assert y.shape == x.shape and y.dtype == x.dtype
    assert jnp.allclose(y.astype(jnp.float32), y_ref.astype(jnp.float32),
                        atol=5e-2, rtol=5e-2)

    # --- row count just below a tile boundary (masked partial last block) ---
    x2 = jax.random.normal(kx2, (3, 5, d), dtype=jnp.float32).astype(jnp.bfloat16)
    y2 = jax.block_until_ready(rmsnorm_rotated(x2, eps=1e-5, fused_M=M_bf16))
    y2_ref = rmsnorm_rotated_ref(x2, R, weight, eps=1e-5)
    assert y2.shape == x2.shape and y2.dtype == x2.dtype
    assert jnp.allclose(y2.astype(jnp.float32), y2_ref.astype(jnp.float32),
                        atol=5e-2, rtol=5e-2)

    # --- fp32 activations -> fp32 MXU path; multi-block row grid ------------
    x3 = jax.random.normal(kx3, (5, 8, d), dtype=jnp.float32)
    y3 = jax.block_until_ready(
        rmsnorm_rotated(x3, R, weight, eps=1e-5, max_rows=16))
    y3_ref = rmsnorm_rotated_ref(x3, R, weight, eps=1e-5)
    assert y3.shape == x3.shape and y3.dtype == x3.dtype
    assert jnp.allclose(y3, y3_ref, atol=2e-3, rtol=2e-3)

    print("KERNEL_OK")
</pallas_src>

<mosaic_0001>
module attributes {stable_mosaic.version = 11 : i64} {
  func.func @_rmsnorm_rotated_kernel(%arg0: i32, %arg1: i32, %arg2: memref<16x128xbf16, #tpu.memory_space<vmem>>, %arg3: memref<128x128xbf16, #tpu.memory_space<vmem>>, %arg4: memref<16x128xbf16, #tpu.memory_space<vmem>>, %arg5: memref<16x1xf32, #tpu.memory_space<vmem>>) attributes {dimension_semantics = [#tpu.dimension_semantics<parallel>, #tpu.dimension_semantics<arbitrary>], iteration_bounds = array<i64: 1, 1>, scalar_prefetch = 0 : i64, scratch_operands = 1 : i64, tpu.core_type = #tpu.core_type<tc>, window_params = [{transform_indices = @transform_0, window_bounds = array<i64: 16, 128>}, {pipeline_mode = #tpu.pipeline_mode<synchronous>, transform_indices = @transform_1, window_bounds = array<i64: 128, 128>}, {transform_indices = @transform_2, window_bounds = array<i64: 16, 128>}]} {
    %c0_i32 = arith.constant 0 : i32
    %0 = arith.cmpi eq, %arg1, %c0_i32 : i32
    %1 = arith.extui %0 : i1 to i32
    %c0_i32_0 = arith.constant 0 : i32
    %2 = arith.cmpi ne, %1, %c0_i32_0 : i32
    scf.if %2 {
      %c0_8 = arith.constant 0 : index
      %c0_9 = arith.constant 0 : index
      %11 = vector.load %arg2[%c0_8, %c0_9] : memref<16x128xbf16, #tpu.memory_space<vmem>>, vector<16x128xbf16>
      %12 = arith.extf %11 : vector<16x128xbf16> to vector<16x128xf32>
      %13 = arith.mulf %12, %12 : vector<16x128xf32>
      %cst_10 = arith.constant dense<0.000000e+00> : vector<16xf32>
      %14 = vector.multi_reduction <add>, %13, %cst_10 [1] : vector<16x128xf32> to vector<16xf32>
      %15 = vector.shape_cast %14 : vector<16xf32> to vector<16x1xf32>
      %cst_11 = arith.constant 1.280000e+02 : f32
      %16 = vector.broadcast %cst_11 : f32 to vector<16x1xf32>
      %17 = arith.divf %15, %16 : vector<16x1xf32>
      %cst_12 = arith.constant 9.99999974E-6 : f32
      %18 = vector.broadcast %cst_12 : f32 to vector<16x1xf32>
      %19 = arith.addf %17, %18 : vector<16x1xf32>
      %20 = math.rsqrt %19 : vector<16x1xf32>
      %c0_13 = arith.constant 0 : index
      %c0_14 = arith.constant 0 : index
      %21 = vector.load %arg5[%c0_13, %c0_14] : memref<16x1xf32, #tpu.memory_space<vmem>>, vector<16x1xf32>
      tpu.vector_store %arg5[%c0_13, %c0_14], %20 {strides = array<i32>} : memref<16x1xf32, #tpu.memory_space<vmem>>, vector<16x1xf32>,
    } else {
    }
    %c0 = arith.constant 0 : index
    %c0_1 = arith.constant 0 : index
    %3 = vector.load %arg2[%c0, %c0_1] : memref<16x128xbf16, #tpu.memory_space<vmem>>, vector<16x128xbf16>
    %c0_2 = arith.constant 0 : index
    %c0_3 = arith.constant 0 : index
    %4 = vector.load %arg3[%c0_2, %c0_3] : memref<128x128xbf16, #tpu.memory_space<vmem>>, vector<128x128xbf16>
    %cst = arith.constant dense<0.000000e+00> : vector<16x128xf32>
    %5 = tpu.matmul %3, %4, %cst {dimension_numbers = #tpu.dot_dimension_numbers<[1], [0], [0], [1], [0, 0, 1, 1], [], []>} : vector<16x128xbf16>, vector<128x128xbf16>, vector<16x128xf32> -> vector<16x128xf32>
    %c0_4 = arith.constant 0 : index
    %c0_5 = arith.constant 0 : index
    %6 = vector.load %arg5[%c0_4, %c0_5] : memref<16x1xf32, #tpu.memory_space<vmem>>, vector<16x1xf32>
    %7 = vector.broadcast %6 : vector<16x1xf32> to vector<16x128xf32>
    %8 = arith.mulf %5, %7 : vector<16x128xf32>
    %9 = arith.truncf %8 : vector<16x128xf32> to vector<16x128xbf16>
    %c0_6 = arith.constant 0 : index
    %c0_7 = arith.constant 0 : index
    %10 = vector.load %arg4[%c0_6, %c0_7] : memref<16x128xbf16, #tpu.memory_space<vmem>>, vector<16x128xbf16>
    tpu.vector_store %arg4[%c0_6, %c0_7], %9 {strides = array<i32>} : memref<16x128xbf16, #tpu.memory_space<vmem>>, vector<16x128xbf16>,
    return
  }
  func.func @transform_0(%arg0: i32, %arg1: i32) -> (i32, i32) {
    %c0_i32 = arith.constant 0 : i32
    %c0_i32_0 = arith.constant 0 : i32
    return %arg0, %c0_i32 : i32, i32
  }
  func.func @transform_1(%arg0: i32, %arg1: i32) -> (i32, i32) {
    %c0_i32 = arith.constant 0 : i32
    %c0_i32_0 = arith.constant 0 : i32
    return %c0_i32, %arg1 : i32, i32
  }
  func.func @transform_2(%arg0: i32, %arg1: i32) -> (i32, i32) {
    %c0_i32 = arith.constant 0 : i32
    return %arg0, %arg1 : i32, i32
  }
}

module attributes {stable_mosaic.version = 11 : i64} {
  func.func @_rmsnorm_rotated_kernel(%arg0: i32, %arg1: i32, %arg2: memref<16x128xbf16, #tpu.memory_space<vmem>>, %arg3: memref<128x128xbf16, #tpu.memory_space<vmem>>, %arg4: memref<16x128xbf16, #tpu.memory_space<vmem>>, %arg5: memref<16x1xf32, #tpu.memory_space<vmem>>) attributes {dimension_semantics = [#tpu.dimension_semantics<parallel>, #tpu.dimension_semantics<arbitrary>], iteration_bounds = array<i64: 1, 1>, scalar_prefetch = 0 : i64, scratch_operands = 1 : i64, tpu.core_type = #tpu.core_type<tc>, window_params = [{transform_indices = @transform_0, window_bounds = array<i64: 16, 128>}, {transform_indices = @transform_1, window_bounds = array<i64: 128, 128>}, {transform_indices = @transform_2, window_bounds = array<i64: 16, 128>}]} {
    %c0_i32 = arith.constant 0 : i32
    %0 = arith.cmpi eq, %arg1, %c0_i32 : i32
    %1 = arith.extui %0 : i1 to i32
    %c0_i32_0 = arith.constant 0 : i32
    %2 = arith.cmpi ne, %1, %c0_i32_0 : i32
    scf.if %2 {
      %c0_8 = arith.constant 0 : index
      %c0_9 = arith.constant 0 : index
      %11 = vector.load %arg2[%c0_8, %c0_9] : memref<16x128xbf16, #tpu.memory_space<vmem>>, vector<16x128xbf16>
      %12 = arith.extf %11 : vector<16x128xbf16> to vector<16x128xf32>
      %13 = arith.mulf %12, %12 : vector<16x128xf32>
      %cst_10 = arith.constant dense<0.000000e+00> : vector<16xf32>
      %14 = vector.multi_reduction <add>, %13, %cst_10 [1] : vector<16x128xf32> to vector<16xf32>
      %15 = vector.shape_cast %14 : vector<16xf32> to vector<16x1xf32>
      %cst_11 = arith.constant 1.280000e+02 : f32
      %16 = vector.broadcast %cst_11 : f32 to vector<16x1xf32>
      %17 = arith.divf %15, %16 : vector<16x1xf32>
      %cst_12 = arith.constant 9.99999974E-6 : f32
      %18 = vector.broadcast %cst_12 : f32 to vector<16x1xf32>
      %19 = arith.addf %17, %18 : vector<16x1xf32>
      %20 = math.rsqrt %19 : vector<16x1xf32>
      %c0_13 = arith.constant 0 : index
      %c0_14 = arith.constant 0 : index
      %21 = vector.load %arg5[%c0_13, %c0_14] : memref<16x1xf32, #tpu.memory_space<vmem>>, vector<16x1xf32>
      tpu.vector_store %arg5[%c0_13, %c0_14], %20 {strides = array<i32>} : memref<16x1xf32, #tpu.memory_space<vmem>>, vector<16x1xf32>,
    } else {
    }
    %c0 = arith.constant 0 : index
    %c0_1 = arith.constant 0 : index
    %3 = vector.load %arg2[%c0, %c0_1] : memref<16x128xbf16, #tpu.memory_space<vmem>>, vector<16x128xbf16>
    %c0_2 = arith.constant 0 : index
    %c0_3 = arith.constant 0 : index
    %4 = vector.load %arg3[%c0_2, %c0_3] : memref<128x128xbf16, #tpu.memory_space<vmem>>, vector<128x128xbf16>
    %cst = arith.constant dense<0.000000e+00> : vector<16x128xf32>
    %5 = tpu.matmul %3, %4, %cst {dimension_numbers = #tpu.dot_dimension_numbers<[1], [0], [0], [1], [0, 0, 1, 1], [], []>} : vector<16x128xbf16>, vector<128x128xbf16>, vector<16x128xf32> -> vector<16x128xf32>
    %c0_4 = arith.constant 0 : index
    %c0_5 = arith.constant 0 : index
    %6 = vector.load %arg5[%c0_4, %c0_5] : memref<16x1xf32, #tpu.memory_space<vmem>>, vector<16x1xf32>
    %7 = vector.broadcast %6 : vector<16x1xf32> to vector<16x128xf32>
    %8 = arith.mulf %5, %7 : vector<16x128xf32>
    %9 = arith.truncf %8 : vector<16x128xf32> to vector<16x128xbf16>
    %c0_6 = arith.constant 0 : index
    %c0_7 = arith.constant 0 : index
    %10 = vector.load %arg4[%c0_6, %c0_7] : memref<16x128xbf16, #tpu.memory_space<vmem>>, vector<16x128xbf16>
    tpu.vector_store %arg4[%c0_6, %c0_7], %9 {strides = array<i32>} : memref<16x128xbf16, #tpu.memory_space<vmem>>, vector<16x128xbf16>,
    return
  }
  func.func @transform_0(%arg0: i32, %arg1: i32) -> (i32, i32) {
    %c0_i32 = arith.constant 0 : i32
    %c0_i32_0 = arith.constant 0 : i32
    return %arg0, %c0_i32 : i32, i32
  }
  func.func @transform_1(%arg0: i32, %arg1: i32) -> (i32, i32) {
    %c0_i32 = arith.constant 0 : i32
    %c0_i32_0 = arith.constant 0 : i32
    return %c0_i32, %arg1 : i32, i32
  }
  func.func @transform_2(%arg0: i32, %arg1: i32) -> (i32, i32) {
    %c0_i32 = arith.constant 0 : i32
    return %arg0, %arg1 : i32, i32
  }
}

</mosaic_0001>

<bundles_post_ra>
// kernel: tpu_custom_call.1
= control target key start
LH: loop header
LB: loop body
LE: loop exit
PB: predicated region body
PF: predicated region fallthrough
CT: control target
= control target key end

     0   :  { %7 = vsyncpa [#allocation4], 0  ;;  %s401_s0 = inlined_call_operand.hbm [shape: bf16[16,128], index: 0, kind: input, shape index: {}]   ;;  %s402_s1 = inlined_call_operand.hbm [shape: bf16[128,128], index: 1, kind: input, shape index: {}]   ;;  %s403_s2 = inlined_call_operand.hbm [shape: bf16[16,128], index: 2, kind: output, shape index: {}]  }
   0x1   :  { %8 = vsyncpa [#allocation7], 0 }
   0x2   :  { %9 = vsyncpa [#allocation5], 0  ;;  %s360_s9 = smov [#allocation3]  }
   0x3   :  { %s15_s10 = sshll.u32 %s360_s9, 4  ;;  %s16_s10 = int_to_ptr.vmem [resolvable:$true] %s15_s10 }
   0x4   :  { %s302_s11 = scalar_lea.vmem %s16_s10, 128  ;;  %p307_p1 = scmp.lt.s32.totalorder %s16_s10, %s16_s10 }
   0x5   :  { %p303_p0 = scmp.ne.s32.totalorder %s16_s10, %s302_s11  ;;  %p308_p2 = scmp.lt.s32.totalorder %s302_s11, %s302_s11 }
   0x7   :  { %p309_p3 = por %p308_p2, %p307_p1 }
   0x9   :  { %p310_p4 = pnand %p309_p3, %p303_p0 }
   0xb   :  { %313 = shalt.err (!%p310_p4)
}
   0xc   :  { %s361_s12 = smov 64   ;;  %s362_s13 = smov 4  }
   0xd   :  { %21 = dma.hbm_to_vmem [thread:$0]  %s401_s0, 128, %s16_s10, [#allocation4], %s361_s12, %s361_s12, %s362_s13  }
   0xe   :  { %s363_s16 = smov [#allocation6]  }
   0xf   :  { %s27_s17 = sshll.u32 %s363_s16, 4  ;;  %s28_s17 = int_to_ptr.vmem [resolvable:$true] %s27_s17 }
  0x10   :  { %s322_s18 = scalar_lea.vmem %s28_s17, 1024  ;;  %p327_p6 = scmp.lt.s32.totalorder %s28_s17, %s28_s17 }
  0x11   :  { %p323_p5 = scmp.ne.s32.totalorder %s28_s17, %s322_s18  ;;  %p328_p7 = scmp.lt.s32.totalorder %s322_s18, %s322_s18 }
  0x13   :  { %p329_p8 = por %p328_p7, %p327_p6 }
  0x15   :  { %p330_p9 = pnand %p329_p8, %p323_p5 }
  0x17   :  { %333 = shalt.err (!%p330_p9)
}
  0x18   :  { %33 = dma.hbm_to_vmem [thread:$0]  %s402_s1, 1024, %s28_s17, [#allocation7], %s361_s12, %s361_s12, %s362_s13  }
  0x19   :  { %354 = dma.done.wait [#allocation4], 128  }
  0x1a   :  { %355 = vsyncadd [#allocation4], 4294967168 }
  0x1b   :  { %356 = dma.done.wait [#allocation7], 1024  }
  0x1c   :  { %357 = vsyncadd [#allocation7], 4294966272  ;;  %v364_v0 = vmov 0.0   ;;  %vm365_vm0 = vmmov 0   ;;  %v234_v1 = vld [vmem:[#allocation3] sm:$0xff]   ;;  %v282_v6 = vld [vmem:[#allocation6 + $0x30] sm:$0xff]  }
  0x1d   :  { %251 = vmatprep.subr.bf16.mxu0 %v364_v0  ;;  %267 = vmatprep.mubr.msk.bf16.mxu0 %vm365_vm0, %v364_v0  ;;  %v235_v2 = vunpack.c.l.bf16 %v234_v1  ;;  %v236_v3 = vunpack.c.h.bf16 %v234_v1  ;;  %v281_v4 = vld [vmem:[#allocation6 + $0x38] sm:$0xff]   ;;  %v283_v8 = vld [vmem:[#allocation6 + $0x28] sm:$0xff]   ;;  %v284_v9 = vld [vmem:[#allocation6 + $0x20] sm:$0xff]   ;;  %v366_v15 = vmov 0   ;;  %vm62_vm1 = vcmask 7168   ;;  %s367_s0 = smov [#allocation8]  }
  0x1e   :  { %252 = vmatpush3.bf16.msra.mxu0 %v281_v4  ;;  %v285_v10 = vld [vmem:[#allocation6 + $0x18] sm:$0xff]   ;;  %v286_v11 = vld [vmem:[#allocation6 + $0x10] sm:$0xff]   ;;  %v287_v12 = vld [vmem:[#allocation6 + $0x8] sm:$0xff]   ;;  %279 = vset.pattern.permute.xlu1 %v366_v15  ;;  %s207_s1 = sshll.u32 %s367_s0, 4  ;;  %s208_s1 = int_to_ptr.vmem [resolvable:$true] %s207_s1 }
  0x1f   :  { %v49_v5 = vmul.f32 %v235_v2, %v235_v2  ;;  %253 = vmatprep.subr.bf16.mxu0 %v364_v0  ;;  %v50_v7 = vmul.f32 %v236_v3, %v236_v3  ;;  %v288_v13 = vld [vmem:[#allocation6] sm:$0xff]   ;;  %v289_v14 = vld [vmem:[#allocation3] sm:$0xff]   ;;  %280 = vset.pattern.permute.xlu0 %v366_v15  ;;  %s334_s21 = scalar_lea.vmem %s208_s1, 128  ;;  %p339_p11 = scmp.lt.s32.totalorder %s208_s1, %s208_s1 }
  0x20   :  { %p335_p10 = scmp.ne.s32.totalorder %s208_s1, %s334_s21  ;;  %p340_p12 = scmp.lt.s32.totalorder %s334_s21, %s334_s21 }
  0x21   :  { %51 = vadd.xlane.f32.xlu0 %v49_v5 }
  0x22   :  { %254 = vmatpush3.bf16.msra.mxu0 %v282_v6  ;;  %p341_p13 = por %p340_p12, %p339_p11 }
  0x23   :  { %255 = vmatprep.subr.bf16.mxu0 %v364_v0 }
  0x24   :  { %p342_p0 = pnand %p341_p13, %p335_p10 }
  0x25   :  { %53 = vadd.xlane.f32.xlu0 %v50_v7 }
  0x26   :  { %256 = vmatpush3.bf16.msra.mxu0 %v283_v8 }
  0x27   :  { %257 = vmatprep.subr.bf16.mxu0 %v364_v0 }
  0x2a   :  { %258 = vmatpush3.bf16.msra.mxu0 %v284_v9 }
  0x2b   :  { %259 = vmatprep.subr.bf16.mxu0 %v364_v0 }
  0x2e   :  { %260 = vmatpush3.bf16.msra.mxu0 %v285_v10 }
  0x2f   :  { %261 = vmatprep.subr.bf16.mxu0 %v364_v0 }
  0x32   :  { %262 = vmatpush3.bf16.msra.mxu0 %v286_v11 }
  0x33   :  { %263 = vmatprep.subr.bf16.mxu0 %v364_v0 }
  0x36   :  { %264 = vmatpush3.bf16.msra.mxu0 %v287_v12 }
  0x37   :  { %265 = vmatprep.subr.bf16.mxu0 %v364_v0 }
  0x3a   :  { %266 = vmatpush3.bf16.msra.mxu0 %v288_v13 }
  0x3d   :  { %268 = vmatmul.mubr.bf16.vlgmr.msra.gmra.mxu0 %v289_v14 }
  0xaa   :  { %v52_v16 = vpop.xlane.xlu0 %51 }
  0xab   :  { %v56_v17 = vmul.f32 0.0078125, %v52_v16 }
  0xad   :  { %v58_v18 = vadd.f32 1e-05, %v56_v17 }
  0xae   :  { %v54_v19 = vpop.xlane.xlu0 %53 }
  0xaf   :  { %290 = vrsqrt.f32 %v58_v18  ;;  %v57_v20 = vmul.f32 0.0078125, %v54_v19 }
  0xb1   :  { %v59_v21 = vadd.f32 1e-05, %v57_v20 }
  0xb3   :  { %292 = vrsqrt.f32 %v59_v21 }
  0xbc   :  { %v291_v22 = vpop.eup %290 }
  0xbd   :  { %63 = vst.msk [vmem:[#allocation2] sm:$0xff] %vm62_vm1, %v291_v22 }
  0xc0   :  { %v293_v23 = vpop.eup %292 }
  0xc1   :  { %64 = vst.msk [vmem:[#allocation2 + $0x8] sm:$0xff] %vm62_vm1, %v293_v23 }
  0xc4   :  { %v178_v24 = vld [vmem:[#allocation2] sm:$0xff] }
  0xc5   :  { %182 = vperm.xlu1 %279, %v178_v24  }
  0xc8   :  { %v179_v25 = vld [vmem:[#allocation2 + $0x8] sm:$0xff] }
  0xc9   :  { %187 = vperm.xlu1 %279, %v179_v25  }
  0xfd   :  { %v171_v26 = vpop.f32.mrf.mxu0 }
  0xff   :  { %v269_v27 = vpop.f32.mrf.mxu0 }
 0x101   :  { %v174_v28 = vpop.f32.mrf.mxu0 }
 0x103   :  { %v270_v29 = vpop.f32.mrf.mxu0 }
 0x140   :  { %v183_v30 = vpop.permute.xlu1 %182 }
 0x141   :  { %v190_v32 = vmul.f32 %v183_v30, %v171_v26 }
 0x144   :  { %v188_v31 = vpop.permute.xlu1 %187 }
 0x145   :  { %v191_v33 = vmul.f32 %v188_v31, %v174_v28 }
 0x147   :  { %v240_v34 = vpack.c.bf16 %v191_v33, %v190_v32 }
 0x149   :  { %241 = vst [vmem:[#allocation8] sm:$0xff] %v240_v34  }
 0x14a   :  { %345 = shalt.err (!%p342_p0)
}
 0x14b   :  { %213 = dma.vmem_to_hbm [thread:$0]  %s208_s1, 128, %s403_s2, [#allocation5], %s361_s12, %s361_s12, %s362_s13  }
 0x14c   :  { %358 = dma.done.wait [#allocation5], 128  }
 0x14d   :  { %359 = vsyncadd [#allocation5], 4294967168 }
 0x14e   :  { %217 = vsyncpa [#allocation4], 1 }
 0x14f   :  { %218 = vsyncpa [#allocation7], 1 }
 0x150   :  { %219 = vsyncpa [#allocation5], 1 }

// kernel: tpu_custom_call.1
= control target key start
LH: loop header
LB: loop body
LE: loop exit
PB: predicated region body
PF: predicated region fallthrough
CT: control target
= control target key end

     0   :  { %7 = vsyncpa [#allocation4], 0  ;;  %s401_s0 = inlined_call_operand.hbm [shape: bf16[16,128], index: 0, kind: input, shape index: {}]   ;;  %s402_s1 = inlined_call_operand.hbm [shape: bf16[128,128], index: 1, kind: input, shape index: {}]   ;;  %s403_s2 = inlined_call_operand.hbm [shape: bf16[16,128], index: 2, kind: output, shape index: {}]  }
   0x1   :  { %8 = vsyncpa [#allocation7], 0 }
   0x2   :  { %9 = vsyncpa [#allocation5], 0  ;;  %s360_s9 = smov [#allocation3]  }
   0x3   :  { %s15_s10 = sshll.u32 %s360_s9, 4  ;;  %s16_s10 = int_to_ptr.vmem [resolvable:$true] %s15_s10 }
   0x4   :  { %s302_s11 = scalar_lea.vmem %s16_s10, 128  ;;  %p307_p1 = scmp.lt.s32.totalorder %s16_s10, %s16_s10 }
   0x5   :  { %p303_p0 = scmp.ne.s32.totalorder %s16_s10, %s302_s11  ;;  %p308_p2 = scmp.lt.s32.totalorder %s302_s11, %s302_s11 }
   0x7   :  { %p309_p3 = por %p308_p2, %p307_p1 }
   0x9   :  { %p310_p4 = pnand %p309_p3, %p303_p0 }
   0xb   :  { %313 = shalt.err (!%p310_p4)
}
   0xc   :  { %s361_s12 = smov 64   ;;  %s362_s13 = smov 4  }
   0xd   :  { %21 = dma.hbm_to_vmem [thread:$0]  %s401_s0, 128, %s16_s10, [#allocation4], %s361_s12, %s361_s12, %s362_s13  }
   0xe   :  { %s363_s16 = smov [#allocation6]  }
   0xf   :  { %s27_s17 = sshll.u32 %s363_s16, 4  ;;  %s28_s17 = int_to_ptr.vmem [resolvable:$true] %s27_s17 }
  0x10   :  { %s322_s18 = scalar_lea.vmem %s28_s17, 1024  ;;  %p327_p6 = scmp.lt.s32.totalorder %s28_s17, %s28_s17 }
  0x11   :  { %p323_p5 = scmp.ne.s32.totalorder %s28_s17, %s322_s18  ;;  %p328_p7 = scmp.lt.s32.totalorder %s322_s18, %s322_s18 }
  0x13   :  { %p329_p8 = por %p328_p7, %p327_p6 }
  0x15   :  { %p330_p9 = pnand %p329_p8, %p323_p5 }
  0x17   :  { %333 = shalt.err (!%p330_p9)
}
  0x18   :  { %33 = dma.hbm_to_vmem [thread:$0]  %s402_s1, 1024, %s28_s17, [#allocation7], %s361_s12, %s361_s12, %s362_s13  }
  0x19   :  { %354 = dma.done.wait [#allocation4], 128  }
  0x1a   :  { %355 = vsyncadd [#allocation4], 4294967168 }
  0x1b   :  { %356 = dma.done.wait [#allocation7], 1024  }
  0x1c   :  { %357 = vsyncadd [#allocation7], 4294966272  ;;  %v364_v0 = vmov 0.0   ;;  %vm365_vm0 = vmmov 0   ;;  %v234_v1 = vld [vmem:[#allocation3] sm:$0xff]   ;;  %v282_v6 = vld [vmem:[#allocation6 + $0x30] sm:$0xff]  }
  0x1d   :  { %251 = vmatprep.subr.bf16.mxu0 %v364_v0  ;;  %267 = vmatprep.mubr.msk.bf16.mxu0 %vm365_vm0, %v364_v0  ;;  %v235_v2 = vunpack.c.l.bf16 %v234_v1  ;;  %v236_v3 = vunpack.c.h.bf16 %v234_v1  ;;  %v281_v4 = vld [vmem:[#allocation6 + $0x38] sm:$0xff]   ;;  %v283_v8 = vld [vmem:[#allocation6 + $0x28] sm:$0xff]   ;;  %v284_v9 = vld [vmem:[#allocation6 + $0x20] sm:$0xff]   ;;  %v366_v15 = vmov 0   ;;  %vm62_vm1 = vcmask 7168   ;;  %s367_s0 = smov [#allocation8]  }
  0x1e   :  { %252 = vmatpush3.bf16.msra.mxu0 %v281_v4  ;;  %v285_v10 = vld [vmem:[#allocation6 + $0x18] sm:$0xff]   ;;  %v286_v11 = vld [vmem:[#allocation6 + $0x10] sm:$0xff]   ;;  %v287_v12 = vld [vmem:[#allocation6 + $0x8] sm:$0xff]   ;;  %279 = vset.pattern.permute.xlu1 %v366_v15  ;;  %s207_s1 = sshll.u32 %s367_s0, 4  ;;  %s208_s1 = int_to_ptr.vmem [resolvable:$true] %s207_s1 }
  0x1f   :  { %v49_v5 = vmul.f32 %v235_v2, %v235_v2  ;;  %253 = vmatprep.subr.bf16.mxu0 %v364_v0  ;;  %v50_v7 = vmul.f32 %v236_v3, %v236_v3  ;;  %v288_v13 = vld [vmem:[#allocation6] sm:$0xff]   ;;  %v289_v14 = vld [vmem:[#allocation3] sm:$0xff]   ;;  %280 = vset.pattern.permute.xlu0 %v366_v15  ;;  %s334_s21 = scalar_lea.vmem %s208_s1, 128  ;;  %p339_p11 = scmp.lt.s32.totalorder %s208_s1, %s208_s1 }
  0x20   :  { %p335_p10 = scmp.ne.s32.totalorder %s208_s1, %s334_s21  ;;  %p340_p12 = scmp.lt.s32.totalorder %s334_s21, %s334_s21 }
  0x21   :  { %51 = vadd.xlane.f32.xlu0 %v49_v5 }
  0x22   :  { %254 = vmatpush3.bf16.msra.mxu0 %v282_v6  ;;  %p341_p13 = por %p340_p12, %p339_p11 }
  0x23   :  { %255 = vmatprep.subr.bf16.mxu0 %v364_v0 }
  0x24   :  { %p342_p0 = pnand %p341_p13, %p335_p10 }
  0x25   :  { %53 = vadd.xlane.f32.xlu0 %v50_v7 }
  0x26   :  { %256 = vmatpush3.bf16.msra.mxu0 %v283_v8 }
  0x27   :  { %257 = vmatprep.subr.bf16.mxu0 %v364_v0 }
  0x2a   :  { %258 = vmatpush3.bf16.msra.mxu0 %v284_v9 }
  0x2b   :  { %259 = vmatprep.subr.bf16.mxu0 %v364_v0 }
  0x2e   :  { %260 = vmatpush3.bf16.msra.mxu0 %v285_v10 }
  0x2f   :  { %261 = vmatprep.subr.bf16.mxu0 %v364_v0 }
  0x32   :  { %262 = vmatpush3.bf16.msra.mxu0 %v286_v11 }
  0x33   :  { %263 = vmatprep.subr.bf16.mxu0 %v364_v0 }
  0x36   :  { %264 = vmatpush3.bf16.msra.mxu0 %v287_v12 }
  0x37   :  { %265 = vmatprep.subr.bf16.mxu0 %v364_v0 }
  0x3a   :  { %266 = vmatpush3.bf16.msra.mxu0 %v288_v13 }
  0x3d   :  { %268 = vmatmul.mubr.bf16.vlgmr.msra.gmra.mxu0 %v289_v14 }
  0xaa   :  { %v52_v16 = vpop.xlane.xlu0 %51 }
  0xab   :  { %v56_v17 = vmul.f32 0.0078125, %v52_v16 }
  0xad   :  { %v58_v18 = vadd.f32 1e-05, %v56_v17 }
  0xae   :  { %v54_v19 = vpop.xlane.xlu0 %53 }
  0xaf   :  { %290 = vrsqrt.f32 %v58_v18  ;;  %v57_v20 = vmul.f32 0.0078125, %v54_v19 }
  0xb1   :  { %v59_v21 = vadd.f32 1e-05, %v57_v20 }
  0xb3   :  { %292 = vrsqrt.f32 %v59_v21 }
  0xbc   :  { %v291_v22 = vpop.eup %290 }
  0xbd   :  { %63 = vst.msk [vmem:[#allocation2] sm:$0xff] %vm62_vm1, %v291_v22 }
  0xc0   :  { %v293_v23 = vpop.eup %292 }
  0xc1   :  { %64 = vst.msk [vmem:[#allocation2 + $0x8] sm:$0xff] %vm62_vm1, %v293_v23 }
  0xc4   :  { %v178_v24 = vld [vmem:[#allocation2] sm:$0xff] }
  0xc5   :  { %182 = vperm.xlu1 %279, %v178_v24  }
  0xc8   :  { %v179_v25 = vld [vmem:[#allocation2 + $0x8] sm:$0xff] }
  0xc9   :  { %187 = vperm.xlu1 %279, %v179_v25  }
  0xfd   :  { %v171_v26 = vpop.f32.mrf.mxu0 }
  0xff   :  { %v269_v27 = vpop.f32.mrf.mxu0 }
 0x101   :  { %v174_v28 = vpop.f32.mrf.mxu0 }
 0x103   :  { %v270_v29 = vpop.f32.mrf.mxu0 }
 0x140   :  { %v183_v30 = vpop.permute.xlu1 %182 }
 0x141   :  { %v190_v32 = vmul.f32 %v183_v30, %v171_v26 }
 0x144   :  { %v188_v31 = vpop.permute.xlu1 %187 }
 0x145   :  { %v191_v33 = vmul.f32 %v188_v31, %v174_v28 }
 0x147   :  { %v240_v34 = vpack.c.bf16 %v191_v33, %v190_v32 }
 0x149   :  { %241 = vst [vmem:[#allocation8] sm:$0xff] %v240_v34  }
 0x14a   :  { %345 = shalt.err (!%p342_p0)
}
 0x14b   :  { %213 = dma.vmem_to_hbm [thread:$0]  %s208_s1, 128, %s403_s2, [#allocation5], %s361_s12, %s361_s12, %s362_s13  }
 0x14c   :  { %358 = dma.done.wait [#allocation5], 128  }
 0x14d   :  { %359 = vsyncadd [#allocation5], 4294967168 }
 0x14e   :  { %217 = vsyncpa [#allocation4], 1 }
 0x14f   :  { %218 = vsyncpa [#allocation7], 1 }
 0x150   :  { %219 = vsyncpa [#allocation5], 1 }

</bundles_post_ra>
